<compile_context>
chip_gen: v5e
topology: v5e:2x2
jax: 0.10.0
libtpu: 0.0.40
codegen_flags: <defaults>
</compile_context>

<pallas_src>
import functools

import jax
import jax.numpy as jnp
from jax.experimental import pallas as pl
from jax.experimental.pallas import tpu as pltpu


def _temporal_block_kernel(x_ref, w1_ref, b1_ref, w2_ref, b2_ref, *rest,
                           Bt, K, dil, pad, L, L1, L2, C_in, C_out,
                           has_downsample):
    if has_downsample:
        wd_ref, bd_ref, o_ref, xp_ref, h_ref = rest
    else:
        o_ref, xp_ref, h_ref = rest
        wd_ref = bd_ref = None

    f32 = jnp.float32
    dn = (((1,), (0,)), ((), ()))   # (C_out, C) @ (C, L) -> (C_out, L), no transpose

    # In-kernel zero padding (VMEM only): copy x into the interior of the padded
    # scratch and zero just the halo columns (conv1's zero padding). The conv1
    # output scratch keeps zero halos too (they are conv2's zero padding).
    if pad > 0:
        xp_ref[:, :, :pad] = jnp.zeros((Bt, C_in, pad), xp_ref.dtype)
        xp_ref[:, :, pad + L:] = jnp.zeros((Bt, C_in, pad), xp_ref.dtype)
        h_ref[:, :, :pad] = jnp.zeros((Bt, C_out, pad), h_ref.dtype)
        h_ref[:, :, pad + L1:] = jnp.zeros((Bt, C_out, pad), h_ref.dtype)
    xp_ref[:, :, pad:pad + L] = x_ref[...]

    # Hoist small per-tap weights / biases out of the (unrolled) batch loop.
    w1_taps = [w1_ref[k] for k in range(K)]      # each (C_out, C_in)
    w2_taps = [w2_ref[k] for k in range(K)]      # each (C_out, C_out)
    b1 = b1_ref[...].astype(f32)                 # (C_out, 1), broadcasts along lanes
    b2 = b2_ref[...].astype(f32)
    if has_downsample:
        wd = wd_ref[...]                         # (C_out, C_in)
        bd = bd_ref[...].astype(f32)

    # ---- conv1 (dilated, K taps as MXU matmuls, f32 accumulation) + ReLU ----
    for b in range(Bt):                          # Bt is small & static -> unrolled
        acc = jnp.zeros((C_out, L1), f32)
        for k in range(K):
            xs = xp_ref[b, :, k * dil:k * dil + L1]          # (C_in, L1)
            acc += jax.lax.dot_general(w1_taps[k], xs, dn,
                                       preferred_element_type=f32)
        h_ref[b, :, pad:pad + L1] = jnp.maximum(acc + b1, 0.0).astype(h_ref.dtype)

    # ---- conv2 + residual (1x1 downsample or identity) + ReLU ----
    for b in range(Bt):
        acc = jnp.zeros((C_out, L2), f32)
        for k in range(K):
            hs = h_ref[b, :, k * dil:k * dil + L2]           # (C_out, L2)
            acc += jax.lax.dot_general(w2_taps[k], hs, dn,
                                       preferred_element_type=f32)
        acc = acc + b2

        # Residual path uses the original (unpadded) x.
        x_b = x_ref[b]                                       # (C_in, L)
        if has_downsample:
            res = jax.lax.dot_general(wd, x_b, dn, preferred_element_type=f32) + bd
        else:
            res = x_b.astype(f32)                            # C_in == C_out here

        # Mirror `F.pad(res, (0, L2 - L))`: right-pad zeros / crop (shapes static).
        if L2 == L:
            total = acc + res
        elif L2 < L:
            total = acc + res[:, :L2]
        else:
            total = jnp.concatenate([acc[:, :L] + res, acc[:, L:]], axis=1)

        o_ref[b] = jnp.maximum(total, 0.0).astype(o_ref.dtype)


def temporal_block(x, w1, b1, w2, b2, w_ds=None, b_ds=None, *,
                   stride=1, dilation=1, padding=1, batch_tile=None):
    """Fused TemporalBlock forward.

    x:  [B, C_in, L]
    w1: [C_out, C_in, K], b1: [C_out]
    w2: [C_out, C_out, K], b2: [C_out]
    w_ds/b_ds: optional 1x1 downsample conv ([C_out, C_in, 1], [C_out]).
    Returns [B, C_out, L_out].
    """
    B, C_in, L = x.shape
    C_out, _, K = w1.shape
    assert w2.shape == (C_out, C_out, K)
    assert stride == 1, "TODO(synk): stride > 1 not implemented"

    def _out_len(l_in):
        return (l_in + 2 * padding - dilation * (K - 1) - 1) // stride + 1

    L1 = _out_len(L)          # conv1 output length
    L2 = _out_len(L1)         # conv2 output length (== final length)
    assert L1 >= 1 and L2 >= 1

    has_downsample = w_ds is not None
    if not has_downsample:
        assert C_in == C_out, "identity residual requires n_inputs == n_outputs"

    # Tap-major weights: each tap is a contiguous 2-D (C_out, C) slice in-kernel.
    w1_t = jnp.transpose(w1, (2, 0, 1))          # (K, C_out, C_in)
    w2_t = jnp.transpose(w2, (2, 0, 1))          # (K, C_out, C_out)
    b1_2 = b1.reshape(C_out, 1)
    b2_2 = b2.reshape(C_out, 1)

    # Batch tile: small (bounded unroll), but keep >= 2 grid steps when possible so
    # the 'parallel' axis can be sharded across v7x's two TensorCores.
    if batch_tile is None:
        batch_tile = max(1, min(8, B // 2)) if B >= 2 else 1
    Bt = max(1, min(batch_tile, B))
    while B % Bt:
        Bt -= 1

    kernel = functools.partial(
        _temporal_block_kernel, Bt=Bt, K=K, dil=dilation, pad=padding,
        L=L, L1=L1, L2=L2, C_in=C_in, C_out=C_out,
        has_downsample=has_downsample)

    in_specs = [
        pl.BlockSpec((Bt, C_in, L), lambda i: (i, 0, 0)),        # x (unpadded)
        pl.BlockSpec((K, C_out, C_in), lambda i: (0, 0, 0)),     # w1 (tap-major)
        pl.BlockSpec((C_out, 1), lambda i: (0, 0)),              # b1
        pl.BlockSpec((K, C_out, C_out), lambda i: (0, 0, 0)),    # w2 (tap-major)
        pl.BlockSpec((C_out, 1), lambda i: (0, 0)),              # b2
    ]
    args = [x, w1_t, b1_2, w2_t, b2_2]
    if has_downsample:
        in_specs += [pl.BlockSpec((C_out, C_in), lambda i: (0, 0)),   # downsample W
                     pl.BlockSpec((C_out, 1), lambda i: (0, 0))]      # downsample b
        args += [w_ds.reshape(C_out, C_in), b_ds.reshape(C_out, 1)]

    itemsize = jnp.dtype(x.dtype).itemsize
    flops = 2 * B * (K * C_out * C_in * L1 + K * C_out * C_out * L2
                     + (C_out * C_in * L if has_downsample else 0))
    bytes_accessed = itemsize * (B * C_in * L + B * C_out * L2
                                 + K * C_out * (C_in + C_out)
                                 + (C_out * (C_in + 1) if has_downsample else 0)
                                 + 2 * C_out)

    return pl.pallas_call(
        kernel,
        out_shape=jax.ShapeDtypeStruct((B, C_out, L2), x.dtype),
        grid_spec=pltpu.PrefetchScalarGridSpec(
            num_scalar_prefetch=0,
            grid=(B // Bt,),
            in_specs=in_specs,
            out_specs=pl.BlockSpec((Bt, C_out, L2), lambda i: (i, 0, 0)),
            scratch_shapes=[
                pltpu.VMEM((Bt, C_in, L + 2 * padding), x.dtype),    # padded x
                pltpu.VMEM((Bt, C_out, L1 + 2 * padding), x.dtype),  # conv1 out (padded)
            ],
        ),
        compiler_params=pltpu.CompilerParams(
            dimension_semantics=("parallel",),
            vmem_limit_bytes=64 * 1024 * 1024),
        cost_estimate=pl.CostEstimate(
            flops=flops, transcendentals=0, bytes_accessed=bytes_accessed),
    )(*args)


# ----------------------------- pure-JAX reference -----------------------------

def _conv1d_ref(x, w, b, stride, padding, dilation):
    out = jax.lax.conv_general_dilated(
        x, w, window_strides=(stride,), padding=[(padding, padding)],
        rhs_dilation=(dilation,), dimension_numbers=("NCH", "OIH", "NCH"))
    return out + b[None, :, None]


def _temporal_block_ref(x, w1, b1, w2, b2, w_ds, b_ds, *, stride, dilation, padding):
    out = _conv1d_ref(x, w1, b1, stride, padding, dilation)
    out = jnp.maximum(out, 0.0)                     # dropout = identity (eval)
    out = _conv1d_ref(out, w2, b2, stride, padding, dilation)
    res = _conv1d_ref(x, w_ds, b_ds, 1, 0, 1) if w_ds is not None else x
    Lo, Lr = out.shape[2], res.shape[2]
    if Lo != Lr:
        if Lo > Lr:
            res = jnp.pad(res, ((0, 0), (0, 0), (0, Lo - Lr)))
        else:
            res = res[:, :, :Lo]
    return jnp.maximum(out + res, 0.0)


if __name__ == "__main__":
    root = jax.random.PRNGKey(0)

    def make_params(key, C_in, C_out, K, with_ds):
        ks = jax.random.split(key, 6)
        w1 = jax.random.normal(ks[0], (C_out, C_in, K), jnp.float32) * 0.3
        b1 = jax.random.normal(ks[1], (C_out,), jnp.float32) * 0.1
        w2 = jax.random.normal(ks[2], (C_out, C_out, K), jnp.float32) * 0.3
        b2 = jax.random.normal(ks[3], (C_out,), jnp.float32) * 0.1
        if with_ds:
            w_ds = jax.random.normal(ks[4], (C_out, C_in, 1), jnp.float32) * 0.3
            b_ds = jax.random.normal(ks[5], (C_out,), jnp.float32) * 0.1
        else:
            w_ds = b_ds = None
        return w1, b1, w2, b2, w_ds, b_ds

    configs = [
        dict(B=2, C_in=4, C_out=8, L=16, K=3, dilation=1, padding=1),  # downsample path
        dict(B=2, C_in=8, C_out=8, L=16, K=3, dilation=2, padding=2),  # identity residual
        dict(B=2, C_in=4, C_out=8, L=16, K=3, dilation=2, padding=1),  # residual cropped
    ]

    for idx, cfg in enumerate(configs):
        key = jax.random.fold_in(root, idx)
        kx, kp = jax.random.split(key)
        x = jax.random.normal(kx, (cfg["B"], cfg["C_in"], cfg["L"]), jnp.float32)
        with_ds = cfg["C_in"] != cfg["C_out"]
        w1, b1, w2, b2, w_ds, b_ds = make_params(
            kp, cfg["C_in"], cfg["C_out"], cfg["K"], with_ds)

        out = jax.block_until_ready(temporal_block(
            x, w1, b1, w2, b2, w_ds, b_ds,
            stride=1, dilation=cfg["dilation"], padding=cfg["padding"]))
        ref = jax.block_until_ready(_temporal_block_ref(
            x, w1, b1, w2, b2, w_ds, b_ds,
            stride=1, dilation=cfg["dilation"], padding=cfg["padding"]))

        assert out.shape == ref.shape, (idx, out.shape, ref.shape)
        assert jnp.allclose(out, ref, atol=1e-4, rtol=1e-4), \
            f"config {idx}: max abs err {jnp.max(jnp.abs(out - ref))}"

    print("KERNEL_OK")
</pallas_src>

<mosaic_0001>
module attributes {stable_mosaic.version = 11 : i64} {
  func.func @_temporal_block_kernel(%arg0: i32, %arg1: memref<1x4x16xf32, #tpu.memory_space<vmem>>, %arg2: memref<3x8x4xf32, #tpu.memory_space<vmem>>, %arg3: memref<8x1xf32, #tpu.memory_space<vmem>>, %arg4: memref<3x8x8xf32, #tpu.memory_space<vmem>>, %arg5: memref<8x1xf32, #tpu.memory_space<vmem>>, %arg6: memref<8x4xf32, #tpu.memory_space<vmem>>, %arg7: memref<8x1xf32, #tpu.memory_space<vmem>>, %arg8: memref<1x8x16xf32, #tpu.memory_space<vmem>>, %arg9: memref<1x4x18xf32, #tpu.memory_space<vmem>>, %arg10: memref<1x8x18xf32, #tpu.memory_space<vmem>>) attributes {dimension_semantics = [#tpu.dimension_semantics<parallel>], iteration_bounds = array<i64: 2>, scalar_prefetch = 0 : i64, scratch_operands = 2 : i64, tpu.core_type = #tpu.core_type<tc>, window_params = [{transform_indices = @transform_0, window_bounds = array<i64: 1, 4, 16>}, {pipeline_mode = #tpu.pipeline_mode<synchronous>, transform_indices = @transform_1, window_bounds = array<i64: 3, 8, 4>}, {pipeline_mode = #tpu.pipeline_mode<synchronous>, transform_indices = @transform_2, window_bounds = array<i64: 8, 1>}, {pipeline_mode = #tpu.pipeline_mode<synchronous>, transform_indices = @transform_3, window_bounds = array<i64: 3, 8, 8>}, {pipeline_mode = #tpu.pipeline_mode<synchronous>, transform_indices = @transform_4, window_bounds = array<i64: 8, 1>}, {pipeline_mode = #tpu.pipeline_mode<synchronous>, transform_indices = @transform_5, window_bounds = array<i64: 8, 4>}, {pipeline_mode = #tpu.pipeline_mode<synchronous>, transform_indices = @transform_6, window_bounds = array<i64: 8, 1>}, {transform_indices = @transform_7, window_bounds = array<i64: 1, 8, 16>}]} {
    %cst = arith.constant 0.000000e+00 : f32
    %0 = vector.broadcast %cst : f32 to vector<1x4x1xf32>
    %c0 = arith.constant 0 : index
    %c0_0 = arith.constant 0 : index
    %c0_1 = arith.constant 0 : index
    %1 = vector.load %arg9[%c0, %c0_0, %c0_1] : memref<1x4x18xf32, #tpu.memory_space<vmem>>, vector<1x4x1xf32>
    tpu.vector_store %arg9[%c0, %c0_0, %c0_1], %0 {strides = array<i32>} : memref<1x4x18xf32, #tpu.memory_space<vmem>>, vector<1x4x1xf32>,
    %cst_2 = arith.constant 0.000000e+00 : f32
    %2 = vector.broadcast %cst_2 : f32 to vector<1x4x1xf32>
    %c0_3 = arith.constant 0 : index
    %c0_4 = arith.constant 0 : index
    %c17 = arith.constant 17 : index
    %3 = vector.load %arg9[%c0_3, %c0_4, %c17] : memref<1x4x18xf32, #tpu.memory_space<vmem>>, vector<1x4x1xf32>
    tpu.vector_store %arg9[%c0_3, %c0_4, %c17], %2 {strides = array<i32>} : memref<1x4x18xf32, #tpu.memory_space<vmem>>, vector<1x4x1xf32>,
    %cst_5 = arith.constant 0.000000e+00 : f32
    %4 = vector.broadcast %cst_5 : f32 to vector<1x8x1xf32>
    %c0_6 = arith.constant 0 : index
    %c0_7 = arith.constant 0 : index
    %c0_8 = arith.constant 0 : index
    %5 = vector.load %arg10[%c0_6, %c0_7, %c0_8] : memref<1x8x18xf32, #tpu.memory_space<vmem>>, vector<1x8x1xf32>
    tpu.vector_store %arg10[%c0_6, %c0_7, %c0_8], %4 {strides = array<i32>} : memref<1x8x18xf32, #tpu.memory_space<vmem>>, vector<1x8x1xf32>,
    %cst_9 = arith.constant 0.000000e+00 : f32
    %6 = vector.broadcast %cst_9 : f32 to vector<1x8x1xf32>
    %c0_10 = arith.constant 0 : index
    %c0_11 = arith.constant 0 : index
    %c17_12 = arith.constant 17 : index
    %7 = vector.load %arg10[%c0_10, %c0_11, %c17_12] : memref<1x8x18xf32, #tpu.memory_space<vmem>>, vector<1x8x1xf32>
    tpu.vector_store %arg10[%c0_10, %c0_11, %c17_12], %6 {strides = array<i32>} : memref<1x8x18xf32, #tpu.memory_space<vmem>>, vector<1x8x1xf32>,
    %c0_13 = arith.constant 0 : index
    %c0_14 = arith.constant 0 : index
    %c0_15 = arith.constant 0 : index
    %8 = vector.load %arg1[%c0_13, %c0_14, %c0_15] : memref<1x4x16xf32, #tpu.memory_space<vmem>>, vector<1x4x16xf32>
    %c0_16 = arith.constant 0 : index
    %c0_17 = arith.constant 0 : index
    %c1 = arith.constant 1 : index
    %9 = vector.load %arg9[%c0_16, %c0_17, %c1] : memref<1x4x18xf32, #tpu.memory_space<vmem>>, vector<1x4x16xf32>
    tpu.vector_store %arg9[%c0_16, %c0_17, %c1], %8 {strides = array<i32>} : memref<1x4x18xf32, #tpu.memory_space<vmem>>, vector<1x4x16xf32>,
    %c0_18 = arith.constant 0 : index
    %c0_19 = arith.constant 0 : index
    %c0_20 = arith.constant 0 : index
    %10 = vector.load %arg2[%c0_18, %c0_19, %c0_20] : memref<3x8x4xf32, #tpu.memory_space<vmem>>, vector<1x8x4xf32>
    %11 = vector.shape_cast %10 : vector<1x8x4xf32> to vector<8x4xf32>
    %c1_21 = arith.constant 1 : index
    %c0_22 = arith.constant 0 : index
    %c0_23 = arith.constant 0 : index
    %12 = vector.load %arg2[%c1_21, %c0_22, %c0_23] : memref<3x8x4xf32, #tpu.memory_space<vmem>>, vector<1x8x4xf32>
    %13 = vector.shape_cast %12 : vector<1x8x4xf32> to vector<8x4xf32>
    %c2 = arith.constant 2 : index
    %c0_24 = arith.constant 0 : index
    %c0_25 = arith.constant 0 : index
    %14 = vector.load %arg2[%c2, %c0_24, %c0_25] : memref<3x8x4xf32, #tpu.memory_space<vmem>>, vector<1x8x4xf32>
    %15 = vector.shape_cast %14 : vector<1x8x4xf32> to vector<8x4xf32>
    %c0_26 = arith.constant 0 : index
    %c0_27 = arith.constant 0 : index
    %c0_28 = arith.constant 0 : index
    %16 = vector.load %arg4[%c0_26, %c0_27, %c0_28] : memref<3x8x8xf32, #tpu.memory_space<vmem>>, vector<1x8x8xf32>
    %17 = vector.shape_cast %16 : vector<1x8x8xf32> to vector<8x8xf32>
    %c1_29 = arith.constant 1 : index
    %c0_30 = arith.constant 0 : index
    %c0_31 = arith.constant 0 : index
    %18 = vector.load %arg4[%c1_29, %c0_30, %c0_31] : memref<3x8x8xf32, #tpu.memory_space<vmem>>, vector<1x8x8xf32>
    %19 = vector.shape_cast %18 : vector<1x8x8xf32> to vector<8x8xf32>
    %c2_32 = arith.constant 2 : index
    %c0_33 = arith.constant 0 : index
    %c0_34 = arith.constant 0 : index
    %20 = vector.load %arg4[%c2_32, %c0_33, %c0_34] : memref<3x8x8xf32, #tpu.memory_space<vmem>>, vector<1x8x8xf32>
    %21 = vector.shape_cast %20 : vector<1x8x8xf32> to vector<8x8xf32>
    %c0_35 = arith.constant 0 : index
    %c0_36 = arith.constant 0 : index
    %22 = vector.load %arg3[%c0_35, %c0_36] : memref<8x1xf32, #tpu.memory_space<vmem>>, vector<8x1xf32>
    %c0_37 = arith.constant 0 : index
    %c0_38 = arith.constant 0 : index
    %23 = vector.load %arg5[%c0_37, %c0_38] : memref<8x1xf32, #tpu.memory_space<vmem>>, vector<8x1xf32>
    %c0_39 = arith.constant 0 : index
    %c0_40 = arith.constant 0 : index
    %24 = vector.load %arg6[%c0_39, %c0_40] : memref<8x4xf32, #tpu.memory_space<vmem>>, vector<8x4xf32>
    %c0_41 = arith.constant 0 : index
    %c0_42 = arith.constant 0 : index
    %25 = vector.load %arg7[%c0_41, %c0_42] : memref<8x1xf32, #tpu.memory_space<vmem>>, vector<8x1xf32>
    %cst_43 = arith.constant 0.000000e+00 : f32
    %26 = vector.broadcast %cst_43 : f32 to vector<8x16xf32>
    %c0_44 = arith.constant 0 : index
    %c0_45 = arith.constant 0 : index
    %c0_46 = arith.constant 0 : index
    %27 = vector.load %arg9[%c0_44, %c0_45, %c0_46] : memref<1x4x18xf32, #tpu.memory_space<vmem>>, vector<1x4x16xf32>
    %28 = vector.shape_cast %27 : vector<1x4x16xf32> to vector<4x16xf32>
    %cst_47 = arith.constant dense<0.000000e+00> : vector<8x16xf32>
    %29 = tpu.matmul %11, %28, %cst_47 {dimension_numbers = #tpu.dot_dimension_numbers<[1], [0], [0], [1], [0, 0, 1, 1], [], []>} : vector<8x4xf32>, vector<4x16xf32>, vector<8x16xf32> -> vector<8x16xf32>
    %30 = arith.addf %26, %29 : vector<8x16xf32>
    %c0_48 = arith.constant 0 : index
    %c0_49 = arith.constant 0 : index
    %c1_50 = arith.constant 1 : index
    %31 = vector.load %arg9[%c0_48, %c0_49, %c1_50] : memref<1x4x18xf32, #tpu.memory_space<vmem>>, vector<1x4x16xf32>
    %32 = vector.shape_cast %31 : vector<1x4x16xf32> to vector<4x16xf32>
    %cst_51 = arith.constant dense<0.000000e+00> : vector<8x16xf32>
    %33 = tpu.matmul %13, %32, %cst_51 {dimension_numbers = #tpu.dot_dimension_numbers<[1], [0], [0], [1], [0, 0, 1, 1], [], []>} : vector<8x4xf32>, vector<4x16xf32>, vector<8x16xf32> -> vector<8x16xf32>
    %34 = arith.addf %30, %33 : vector<8x16xf32>
    %c0_52 = arith.constant 0 : index
    %c0_53 = arith.constant 0 : index
    %c2_54 = arith.constant 2 : index
    %35 = vector.load %arg9[%c0_52, %c0_53, %c2_54] : memref<1x4x18xf32, #tpu.memory_space<vmem>>, vector<1x4x16xf32>
    %36 = vector.shape_cast %35 : vector<1x4x16xf32> to vector<4x16xf32>
    %cst_55 = arith.constant dense<0.000000e+00> : vector<8x16xf32>
    %37 = tpu.matmul %15, %36, %cst_55 {dimension_numbers = #tpu.dot_dimension_numbers<[1], [0], [0], [1], [0, 0, 1, 1], [], []>} : vector<8x4xf32>, vector<4x16xf32>, vector<8x16xf32> -> vector<8x16xf32>
    %38 = arith.addf %34, %37 : vector<8x16xf32>
    %39 = vector.broadcast %22 : vector<8x1xf32> to vector<8x16xf32>
    %40 = arith.addf %38, %39 : vector<8x16xf32>
    %cst_56 = arith.constant 0.000000e+00 : f32
    %41 = vector.broadcast %cst_56 : f32 to vector<8x16xf32>
    %42 = arith.maximumf %40, %41 : vector<8x16xf32>
    %c0_57 = arith.constant 0 : index
    %c0_58 = arith.constant 0 : index
    %c1_59 = arith.constant 1 : index
    %43 = vector.load %arg10[%c0_57, %c0_58, %c1_59] : memref<1x8x18xf32, #tpu.memory_space<vmem>>, vector<1x8x16xf32>
    %44 = vector.shape_cast %43 : vector<1x8x16xf32> to vector<8x16xf32>
    %45 = vector.shape_cast %42 : vector<8x16xf32> to vector<1x8x16xf32>
    tpu.vector_store %arg10[%c0_57, %c0_58, %c1_59], %45 {strides = array<i32>} : memref<1x8x18xf32, #tpu.memory_space<vmem>>, vector<1x8x16xf32>,
    %cst_60 = arith.constant 0.000000e+00 : f32
    %46 = vector.broadcast %cst_60 : f32 to vector<8x16xf32>
    %c0_61 = arith.constant 0 : index
    %c0_62 = arith.constant 0 : index
    %c0_63 = arith.constant 0 : index
    %47 = vector.load %arg10[%c0_61, %c0_62, %c0_63] : memref<1x8x18xf32, #tpu.memory_space<vmem>>, vector<1x8x16xf32>
    %48 = vector.shape_cast %47 : vector<1x8x16xf32> to vector<8x16xf32>
    %cst_64 = arith.constant dense<0.000000e+00> : vector<8x16xf32>
    %49 = tpu.matmul %17, %48, %cst_64 {dimension_numbers = #tpu.dot_dimension_numbers<[1], [0], [0], [1], [0, 0, 1, 1], [], []>} : vector<8x8xf32>, vector<8x16xf32>, vector<8x16xf32> -> vector<8x16xf32>
    %50 = arith.addf %46, %49 : vector<8x16xf32>
    %c0_65 = arith.constant 0 : index
    %c0_66 = arith.constant 0 : index
    %c1_67 = arith.constant 1 : index
    %51 = vector.load %arg10[%c0_65, %c0_66, %c1_67] : memref<1x8x18xf32, #tpu.memory_space<vmem>>, vector<1x8x16xf32>
    %52 = vector.shape_cast %51 : vector<1x8x16xf32> to vector<8x16xf32>
    %cst_68 = arith.constant dense<0.000000e+00> : vector<8x16xf32>
    %53 = tpu.matmul %19, %52, %cst_68 {dimension_numbers = #tpu.dot_dimension_numbers<[1], [0], [0], [1], [0, 0, 1, 1], [], []>} : vector<8x8xf32>, vector<8x16xf32>, vector<8x16xf32> -> vector<8x16xf32>
    %54 = arith.addf %50, %53 : vector<8x16xf32>
    %c0_69 = arith.constant 0 : index
    %c0_70 = arith.constant 0 : index
    %c2_71 = arith.constant 2 : index
    %55 = vector.load %arg10[%c0_69, %c0_70, %c2_71] : memref<1x8x18xf32, #tpu.memory_space<vmem>>, vector<1x8x16xf32>
    %56 = vector.shape_cast %55 : vector<1x8x16xf32> to vector<8x16xf32>
    %cst_72 = arith.constant dense<0.000000e+00> : vector<8x16xf32>
    %57 = tpu.matmul %21, %56, %cst_72 {dimension_numbers = #tpu.dot_dimension_numbers<[1], [0], [0], [1], [0, 0, 1, 1], [], []>} : vector<8x8xf32>, vector<8x16xf32>, vector<8x16xf32> -> vector<8x16xf32>
    %58 = arith.addf %54, %57 : vector<8x16xf32>
    %59 = vector.broadcast %23 : vector<8x1xf32> to vector<8x16xf32>
    %60 = arith.addf %58, %59 : vector<8x16xf32>
    %c0_73 = arith.constant 0 : index
    %c0_74 = arith.constant 0 : index
    %c0_75 = arith.constant 0 : index
    %61 = vector.load %arg1[%c0_73, %c0_74, %c0_75] : memref<1x4x16xf32, #tpu.memory_space<vmem>>, vector<1x4x16xf32>
    %62 = vector.shape_cast %61 : vector<1x4x16xf32> to vector<4x16xf32>
    %cst_76 = arith.constant dense<0.000000e+00> : vector<8x16xf32>
    %63 = tpu.matmul %24, %62, %cst_76 {dimension_numbers = #tpu.dot_dimension_numbers<[1], [0], [0], [1], [0, 0, 1, 1], [], []>} : vector<8x4xf32>, vector<4x16xf32>, vector<8x16xf32> -> vector<8x16xf32>
    %64 = vector.broadcast %25 : vector<8x1xf32> to vector<8x16xf32>
    %65 = arith.addf %63, %64 : vector<8x16xf32>
    %66 = arith.addf %60, %65 : vector<8x16xf32>
    %cst_77 = arith.constant 0.000000e+00 : f32
    %67 = vector.broadcast %cst_77 : f32 to vector<8x16xf32>
    %68 = arith.maximumf %66, %67 : vector<8x16xf32>
    %c0_78 = arith.constant 0 : index
    %c0_79 = arith.constant 0 : index
    %c0_80 = arith.constant 0 : index
    %69 = vector.load %arg8[%c0_78, %c0_79, %c0_80] : memref<1x8x16xf32, #tpu.memory_space<vmem>>, vector<1x8x16xf32>
    %70 = vector.shape_cast %69 : vector<1x8x16xf32> to vector<8x16xf32>
    %71 = vector.shape_cast %68 : vector<8x16xf32> to vector<1x8x16xf32>
    tpu.vector_store %arg8[%c0_78, %c0_79, %c0_80], %71 {strides = array<i32>} : memref<1x8x16xf32, #tpu.memory_space<vmem>>, vector<1x8x16xf32>,
    return
  }
  func.func @transform_0(%arg0: i32) -> (i32, i32, i32) {
    %c0_i32 = arith.constant 0 : i32
    %c0_i32_0 = arith.constant 0 : i32
    %c0_i32_1 = arith.constant 0 : i32
    return %arg0, %c0_i32, %c0_i32_0 : i32, i32, i32
  }
  func.func @transform_1(%arg0: i32) -> (i32, i32, i32) {
    %c0_i32 = arith.constant 0 : i32
    %c0_i32_0 = arith.constant 0 : i32
    %c0_i32_1 = arith.constant 0 : i32
    %c0_i32_2 = arith.constant 0 : i32
    return %c0_i32, %c0_i32_0, %c0_i32_1 : i32, i32, i32
  }
  func.func @transform_2(%arg0: i32) -> (i32, i32) {
    %c0_i32 = arith.constant 0 : i32
    %c0_i32_0 = arith.constant 0 : i32
    %c0_i32_1 = arith.constant 0 : i32
    return %c0_i32, %c0_i32_0 : i32, i32
  }
  func.func @transform_3(%arg0: i32) -> (i32, i32, i32) {
    %c0_i32 = arith.constant 0 : i32
    %c0_i32_0 = arith.constant 0 : i32
    %c0_i32_1 = arith.constant 0 : i32
    %c0_i32_2 = arith.constant 0 : i32
    return %c0_i32, %c0_i32_0, %c0_i32_1 : i32, i32, i32
  }
  func.func @transform_4(%arg0: i32) -> (i32, i32) {
    %c0_i32 = arith.constant 0 : i32
    %c0_i32_0 = arith.constant 0 : i32
    %c0_i32_1 = arith.constant 0 : i32
    return %c0_i32, %c0_i32_0 : i32, i32
  }
  func.func @transform_5(%arg0: i32) -> (i32, i32) {
    %c0_i32 = arith.constant 0 : i32
    %c0_i32_0 = arith.constant 0 : i32
    %c0_i32_1 = arith.constant 0 : i32
    return %c0_i32, %c0_i32_0 : i32, i32
  }
  func.func @transform_6(%arg0: i32) -> (i32, i32) {
    %c0_i32 = arith.constant 0 : i32
    %c0_i32_0 = arith.constant 0 : i32
    %c0_i32_1 = arith.constant 0 : i32
    return %c0_i32, %c0_i32_0 : i32, i32
  }
  func.func @transform_7(%arg0: i32) -> (i32, i32, i32) {
    %c0_i32 = arith.constant 0 : i32
    %c0_i32_0 = arith.constant 0 : i32
    %c0_i32_1 = arith.constant 0 : i32
    return %arg0, %c0_i32, %c0_i32_0 : i32, i32, i32
  }
}

</mosaic_0001>

<bundles_post_ra>
// kernel: tpu_custom_call.1
= control target key start
LH: loop header
LB: loop body
LE: loop exit
PB: predicated region body
PF: predicated region fallthrough
CT: control target
= control target key end

     0   :  { %12 = vsyncpa [#allocation5], 0  ;;  %s910_s0 = inlined_call_operand.vmem [shape: f32[2,4,16], index: 0, kind: input, shape index: {}]   ;;  %s911_s1 = inlined_call_operand.vmem [shape: f32[3,8,4], index: 1, kind: input, shape index: {}]   ;;  %s912_s2 = inlined_call_operand.vmem [shape: f32[8,1], index: 2, kind: input, shape index: {}]   ;;  %s913_s3 = inlined_call_operand.vmem [shape: f32[3,8,8], index: 3, kind: input, shape index: {}]   ;;  %s914_s4 = inlined_call_operand.vmem [shape: f32[8,1], index: 4, kind: input, shape index: {}]   ;;  %s915_s5 = inlined_call_operand.vmem [shape: f32[8,4], index: 5, kind: input, shape index: {}]   ;;  %s916_s6 = inlined_call_operand.vmem [shape: f32[8,1], index: 6, kind: input, shape index: {}]   ;;  %s917_s7 = inlined_call_operand.hbm [shape: f32[2,8,16], index: 7, kind: output, shape index: {}]  }
   0x1   :  { %14 = vsyncpa [#allocation5 + $0x1], 0  ;;  %s777_s24 = smov 0   ;;  %s779_s25 = smov 0  }
   0x2   :  { %s781_s26 = smov 0   ;;  %s783_s27 = smov 0  }
   0x3 LB: > { %s798_s28 = sadd.s32 4294967295, %s730_s27   ;;  %s596_s29 = sadd.s32 4294967294, %s730_s27   ;;  %s730_s27 = sphi %s783_s27, %s923_s27   ;;  %s726_s26 = sphi %s781_s26, %s922_s26   ;;  %s722_s25 = sphi %s779_s25, %s921_s25   ;;  %s718_s24 = sphi %s777_s24, %s920_s24  }
   0x4   : > { %s802_s30 = sadd.s32 1, %s730_s27   ;;  %s179_s8 = sadd.s32 1, %s726_s26 }
   0x5   : > { %s176_s9 = ssub.s32 %s730_s27, %s802_s30  ;;  %p189_p0 = scmp.ne.s32.totalorder %s726_s26, %s722_s25 }
   0x6   : > { %p177_p1 = scmp.eq.s32.totalorder %s176_s9, 0  ;;  %p190_p2 = scmp.eq.s32.totalorder %s798_s28, 1 }
   0x7   : > { %p195_p3 = scmp.ne.s32.totalorder %s722_s25, %s718_s24  ;;  %p196_p4 = scmp.eq.s32.totalorder %s596_s29, 1 }
   0x8   : > { %s813_s10 = scalar_select %p177_p1, %s726_s26, %s179_s8  }
   0x9   : > { %p815_p5 = por %p190_p2, %p189_p0  ;;  %p819_p6 = por %p196_p4, %p195_p3 }
   0xa   : > { %p599_p7 = scmp.ge.s32.totalorder %s730_s27, 1  ;;  %p239_p8 = scmp.lt.s32.totalorder %s730_s27, 3 }
   0xc   : > { %p240_p9 = pnand %p599_p7, %p239_p8 }
   0xd   : > { %p270_p10 = scmp.lt.s32.totalorder (!%p240_p9), %s798_s28, 1  ;;  %s733_s18 = smov (!%p240_p9), 1  }
   0xe   : > { %243 = sbr.rel (%p240_p9) target bundleno = 753 (0x2f1), region = 48  ;;  %s734_s19 = smov (!%p240_p9), 127  }
   0xf   : > { %s735_s20 = smov (!%p240_p9), 126   ;;  %s618_s15 = sshll.u32 (!%p240_p9), %s798_s28, 3 }
  0x10   : > { %s532_s22 = scalar_lea.hbm (!%p240_p9), %s917_s7, %s618_s15  ;;  %s688_s9 = scalar_lea.hbm (!%p240_p9), %s917_s7, 16 }
  0x13   : > { %vm274_vm0 = vcmask 3072   ;;  %vm276_vm1 = vcmask 142472   ;;  %v732_v0 = vmov 0.0   ;;  %s271_s13 = scalar_select %p270_p10, %s798_s28, 1  ;;  %vm287_vm2 = vcmask 134152   ;;  %v289_v4 = vld [vmem:[%s911_s1] sm:$0xff] }
  0x14   : > { %275 = vst.msk [vmem:[#allocation2] sm:$0xf] %vm274_vm0, %v732_v0  ;;  %vm311_vm3 = vcmask 1043456   ;;  %vm307_vm4 = vcmask 31744   ;;  %v299_v5 = vld [vmem:[%s912_s2] sm:$0xff]  ;;  %v736_v6 = vmov 0  }
  0x15   : > { %277 = vst.msk [vmem:[#allocation2] sm:$0xf] %vm276_vm1, %v732_v0  ;;  %s601_s14 = sshll.u32 %s271_s13, 2  ;;  %665 = vset.pattern.permute.xlu1 %v736_v6  ;;  %666 = vset.pattern.permute.xlu2 %v736_v6  ;;  %v300_v7 = vld [vmem:[%s914_s4] sm:$0xff]  ;;  %v603_v8 = vld [vmem:[%s911_s1 + $0x10] sm:$0xff]  ;;  %v602_v9 = vld [vmem:[%s911_s1 + $0x8] sm:$0xff] }
  0x16   : > { %s830_s17 = scalar_lea.vmem %s910_s0, %s601_s14  ;;  %667 = vset.pattern.permute.xlu0 %v736_v6  ;;  %vm278_vm5 = vcmask 7168   ;;  %vm280_vm6 = vcmask 146568   ;;  %vm398_vm7 = vcmask 138248   ;;  %v301_v23 = vld [vmem:[%s915_s5] sm:$0xff]  ;;  %vm405_vm8 = vcmask 64512   ;;  %v604_v26 = vld [vmem:[%s913_s3 + $0x8] sm:$0xff] }
  0x17   : > { %v282_v1 = vld [vmem:[%s830_s17] sm:$0xf]  ;;  %279 = vst.msk [vmem:[#allocation3] sm:$0xff] %vm278_vm5, %v732_v0  ;;  %v605_v28 = vld [vmem:[%s913_s3 + $0x10] sm:$0xff]  ;;  %s267_s13 = sand.u32 1, %s722_s25   ;;  %vm519_vm9 = vcmask 130048  }
  0x18   : > { %284 = vrot.lane.b32.xlu0 %v282_v1, %s733_s18  ;;  %281 = vst.msk [vmem:[#allocation3] sm:$0xff] %vm280_vm6, %v732_v0  ;;  %v485_v22 = vld [vmem:[%s830_s17] sm:$0xf]  ;;  %s600_s14 = sshll.u32 %s267_s13, 3  ;;  %s522_s28 = scalar_lea.sflag [#allocation5], %s267_s13 }
  0x19   : > { %v294_v24 = vld [vmem:[%s913_s3] sm:$0xff] }
  0x1a   : > { %v302_v25 = vld [vmem:[%s916_s6] sm:$0xff] }
  0x8a   : > { %v285_v2 = vpop.permute.xlu0 %284 }
  0x8b   : > { %288 = vst.msk [vmem:[#allocation2] sm:$0xf] %vm287_vm2, %v285_v2 }
  0x92   : > { %v303_v3 = vld [vmem:[#allocation2] sm:$0xf] }
  0x93   : > { %305 = vrot.lane.b32.xlu1 %v303_v3, %s734_s19  ;;  %359 = vrot.lane.b32.xlu0 %v303_v3, %s735_s20 }
  0x94   : > { %608 = vmatpush.msk.msra.mxu1 %vm311_vm3, %v303_v3 }
  0x95   : > { %609 = vmatmul.msk.f32.vlgmr.msra.gmra.mxu1 %vm307_vm4, %v289_v4 }
  0x9b   : > { %389 = vperm.xlu1 %665, %v299_v5  }
  0xa3   : > { %481 = vperm.xlu1 %665, %v300_v7  }
 0x105   : > { %v306_v10 = vpop.permute.xlu1 %305  ;;  %v360_v11 = vpop.permute.xlu0 %359 }
 0x106   : > { %606 = vmatpush.msk.msra.mxu0 %vm311_vm3, %v306_v10  ;;  %610 = vmatpush.msk.msra.mxu2 %vm311_vm3, %v360_v11 }
 0x107   : > { %611 = vmatmul.msk.f32.vlgmr.msra.gmra.mxu2 %vm307_vm4, %v603_v8  ;;  %607 = vmatmul.msk.f32.vlgmr.msra.gmra.mxu0 %vm307_vm4, %v602_v9 }
 0x108   : > { %615 = vmatpush.msk.msrb.mxu2 %vm311_vm3, %v485_v22 }
 0x10d   : > { %v390_v17 = vpop.permute.xlu1 %389 }
 0x10f   : > { %616 = vmatmul.msk.f32.vlgmr.msrb.gmra.mxu2 %vm307_vm4, %v301_v23 }
 0x112   : > { %v356_v13 = vpop.f32.mrf.mxu1 }
 0x115   : > { %v482_v38 = vpop.permute.xlu1 %481 }
 0x184   : > { %v331_v12 = vpop.f32.mrf.mxu0 }
 0x185   : > { %v357_v14 = vadd.f32 %v356_v13, %v331_v12 }
 0x18a   : > { %v383_v15 = vpop.f32.mrf.mxu2 }
 0x18b   : > { %v386_v16 = vadd.f32 %v383_v15, %v357_v14 }
 0x18d   : > { %v392_v18 = vadd.f32 %v390_v17, %v386_v16 }
 0x18f   : > { %v393_v19 = vmax.f32 %v392_v18, 0.0 }
 0x191   : > { %395 = vrot.lane.b32.xlu2 %v393_v19, %s733_s18  ;;  %s269_s18 = scalar_lea.vmem [#allocation4], %s600_s14 }
 0x192   : > { %v514_v33 = vpop.f32.mrf.mxu2  ;;  %s534_s23 = sshll.u32 %s269_s18, 4  ;;  %s535_s23 = int_to_ptr.vmem [resolvable:$true] %s534_s23 }
 0x1eb   : > { %v396_v20 = vpop.permute.xlu2 %395 }
 0x1ec   : > { %399 = vst.msk [vmem:[#allocation3] sm:$0xff] %vm398_vm7, %v396_v20 }
 0x1f3   : > { %v400_v21 = vld [vmem:[#allocation3] sm:$0xff] }
 0x1f4   : > { %452 = vrot.lane.b32.xlu0 %v400_v21, %s735_s20  ;;  %402 = vrot.lane.b32.xlu2 %v400_v21, %s734_s19  ;;  %s536_s20 = sshll.u32 %s532_s22, 4  ;;  %s537_s20 = int_to_ptr.hbm [resolvable:$true] %s536_s20 }
 0x1f5   : > { %447 = vmatpush.msrb.mxu0 %v400_v21  ;;  %s682_s29 = sshra.s32 %s537_s20, 4  ;;  %s683_s29 = int_to_ptr.hbm [resolvable:$true] %s682_s29 }
 0x1f6   : > { %613 = vmatmul.msk.f32.vlgmr.msrb.gmra.mxu0 %vm405_vm8, %v294_v24  ;;  %s684_s17 = scalar_lea.hbm %s683_s29, 8  ;;  %p689_p0 = scmp.lt.s32.totalorder %s683_s29, %s917_s7 }
 0x1f7   : > { %p685_p11 = scmp.ne.s32.totalorder %s683_s29, %s684_s17  ;;  %p690_p1 = scmp.lt.s32.totalorder %s688_s9, %s684_s17 }
 0x1f9   : > { %p686_p12 = pnand %p685_p11, %p815_p5  ;;  %p691_p2 = por %p690_p1, %p689_p0 }
 0x1fb   : > { %p687_p13 = pneg %p686_p12 }
 0x1fc   : > { %488 = vperm.xlu2 %666, %v302_v25  }
 0x1fd   : > { %p692_p3 = pnand %p691_p2, %p687_p13 }
 0x24e   : > { %v403_v27 = vpop.permute.xlu2 %402 }
 0x24f   : > { %424 = vmatpush.msra.mxu3 %v403_v27 }
 0x250   : > { %612 = vmatmul.msk.f32.vlgmr.msra.gmra.mxu3 %vm405_vm8, %v604_v26 }
 0x256   : > { %v489_v34 = vpop.permute.xlu2 %488 }
 0x257   : > { %v515_v37 = vadd.f32 %v514_v33, %v489_v34 }
 0x266   : > { %v453_v29 = vpop.permute.xlu0 %452 }
 0x267   : > { %473 = vmatpush.msrb.mxu1 %v453_v29 }
 0x268   : > { %614 = vmatmul.msk.f32.vlgmr.msrb.gmra.mxu1 %vm405_vm8, %v605_v28 }
 0x273   : > { %v449_v31 = vpop.f32.mrf.mxu0 }
 0x2d3   : > { %v426_v30 = vpop.f32.mrf.mxu3 }
 0x2d4   : > { %v450_v32 = vadd.f32 %v449_v31, %v426_v30 }
 0x2e5   : > { %v475_v35 = vpop.f32.mrf.mxu1 }
 0x2e6   : > { %v478_v36 = vadd.f32 %v475_v35, %v450_v32 }
 0x2e8   : > { %v484_v39 = vadd.f32 %v482_v38, %v478_v36 }
 0x2ea   : > { %v517_v40 = vadd.f32 %v515_v37, %v484_v39 }
 0x2ec   : > { %v518_v41 = vmax.f32 %v517_v40, 0.0 }
 0x2ee   : > { %520 = vst.msk [vmem:[%s269_s18] sm:$0xff] %vm519_vm9, %v518_v41 }
 0x2ef   : > { %695 = shalt.err (!%p692_p3)
}
 0x2f0   : > { %621 = dma.vmem_to_hbm [thread:$0]  (%p815_p5), %s535_s23, 128, %s537_s20, %s522_s28  }
 0x2f1 PF: > { %p627_p4 = scmp.ge.s32.totalorder %s730_s27, 2  ;;  %s548_s13 = sand.u32 1, %s718_s24  }
 0x2f2   : > { %s549_s16 = scalar_lea.sflag [#allocation5], %s548_s13 }
 0x2f3   : > { %p624_p7 = pnand %p627_p4, %p819_p6 }
 0x2f5   : > { %p625_p8 = pneg %p624_p7 }
 0x2f7   : > { %713 = dma.done.wait (%p625_p8), %s549_s16, 128  }
 0x2f8   : > { %715 = vsyncadd (%p625_p8), %s549_s16, 4294967168  ;;  %p17_p9 = scmp.ge.s32.totalorder %s802_s30, 4   ;;  %s920_s24 = smov %s722_s25 }
 0x2f9   : > { %s921_s25 = smov %s726_s26  ;;  %s922_s26 = smov %s813_s10 }
 0x2fa   : > { %s923_s27 = smov %s802_s30  ;;  %19 = sbr.rel (!%p17_p9) target bundleno = 3 (0x3), region = 87 }
 0x2ff   :  { %555 = vsyncpa [#allocation5], 1 }
 0x300   :  { %557 = vsyncpa [#allocation5 + $0x1], 1 }

</bundles_post_ra>
